<compile_context>
chip_gen: v5e
topology: v5e:2x2
jax: 0.10.0
libtpu: 0.0.40
codegen_flags: <defaults>
</compile_context>

<pallas_src>
import math
import functools

import jax
import jax.numpy as jnp
from jax import lax
from jax.experimental import pallas as pl
from jax.experimental.pallas import tpu as pltpu


def _reasoning_attention_kernel(
    q_ref, k_ref, v_ref,
    wq_ref, bq_ref, wk_ref, bk_ref, wv_ref, bv_ref,
    wo_ref, bo_ref,
    out_ref,
    ctx_ref,
    *, dim, bb, nq, nk, scale,
):
    j = pl.program_id(1)  # Dout tile index (innermost, "arbitrary")

    # ---- attention context: computed once per batch block, kept in VMEM ----
    @pl.when(j == 0)
    def _compute_context():
        cdt = q_ref.dtype  # MXU operand dtype (bf16 in the fast path)

        # Pack the whole batch block into the matmul M dimension.
        q2 = q_ref[...].reshape(bb * nq, dim)   # (BB*Nq, D)
        k2 = k_ref[...].reshape(bb * nk, dim)   # (BB*Nk, D)
        v2 = v_ref[...].reshape(bb * nk, dim)   # (BB*Nk, D)

        qp = (jnp.dot(q2, wq_ref[...], preferred_element_type=jnp.float32)
              + bq_ref[...]).reshape(bb, nq, dim)
        kp = (jnp.dot(k2, wk_ref[...], preferred_element_type=jnp.float32)
              + bk_ref[...]).reshape(bb, nk, dim)
        vp = (jnp.dot(v2, wv_ref[...], preferred_element_type=jnp.float32)
              + bv_ref[...]).reshape(bb, nk, dim)

        # Scaled QK^T: contract last dims directly (no kp transpose formed).
        scores = lax.dot_general(
            (qp * scale).astype(cdt), kp.astype(cdt),
            dimension_numbers=(((2,), (2,)), ((0,), (0,))),
            preferred_element_type=jnp.float32)            # (BB, Nq, Nk)

        # Numerically-stable softmax; reciprocal goes to the (idle) EUP slot.
        m = jnp.max(scores, axis=-1, keepdims=True)
        e = jnp.exp(scores - m)
        attn = e * pl.reciprocal(jnp.sum(e, axis=-1, keepdims=True), approx=True)

        ctx = lax.dot_general(
            attn.astype(cdt), vp.astype(cdt),
            dimension_numbers=(((2,), (1,)), ((0,), (0,))),
            preferred_element_type=jnp.float32)            # (BB, Nq, D)

        ctx_ref[...] = ctx.reshape(bb * nq, dim)

    # ---- output projection for this Dout tile: (BB*Nq, D) @ (D, TN) + b ----
    out = jnp.dot(ctx_ref[...].astype(wo_ref.dtype), wo_ref[...],
                  preferred_element_type=jnp.float32) + bo_ref[...]
    out_ref[...] = out.reshape(bb, nq, out_ref.shape[2]).astype(out_ref.dtype)


def reasoning_attention_pallas(q, k, v, params, *, batch_block=None, tn=None,
                               compute_dtype=jnp.bfloat16):
    """q: (B, Nq, D); k, v: (B, Nk, D). Returns (B, Nq, Dout) float32."""
    B, Nq, D = q.shape
    _, Nk, _ = k.shape
    Dout = params["wo"].shape[1]

    # ---- tile-size selection ------------------------------------------------
    if batch_block is None:
        # Pack as many batch rows as possible into the matmul M dim (<=256
        # rows saturates the MXU) while dividing B evenly.
        batch_block = 1
        for cand in range(1, B + 1):
            if B % cand == 0 and cand * Nq <= 256:
                batch_block = cand
    assert B % batch_block == 0

    if tn is None:
        # Largest multiple of 128 dividing Dout, capped at 1024 so the
        # double-buffered w_o tile stays within v7x / v5e VMEM budgets.
        assert Dout % 128 == 0
        t_total = Dout // 128
        best = 1
        for t in range(1, min(t_total, 8) + 1):
            if t_total % t == 0:
                best = t
        tn = 128 * best
    assert Dout % tn == 0 and tn % 128 == 0

    # ---- dtype handling (bf16 weights/activations, f32 accumulation) --------
    qc = q.astype(compute_dtype)
    kc = k.astype(compute_dtype)
    vc = v.astype(compute_dtype)
    wq = params["wq"].astype(compute_dtype)
    wk = params["wk"].astype(compute_dtype)
    wv = params["wv"].astype(compute_dtype)
    wo = params["wo"].astype(compute_dtype)
    bq = params["bq"].astype(jnp.float32).reshape(1, D)
    bk = params["bk"].astype(jnp.float32).reshape(1, D)
    bv = params["bv"].astype(jnp.float32).reshape(1, D)
    bo = params["bo"].astype(jnp.float32).reshape(1, Dout)

    # ---- VMEM budget -> explicit scoped limit --------------------------------
    isz = jnp.dtype(compute_dtype).itemsize
    streamed = (2 * batch_block * Nq * D * isz           # q (double buffered)
                + 2 * 2 * batch_block * Nk * D * isz     # k, v
                + 2 * D * tn * isz                       # w_o tile
                + 2 * tn * 4                             # b_o tile
                + 2 * batch_block * Nq * tn * 4)         # out tile
    resident = 2 * (3 * D * D * isz + 3 * D * 4)         # wq/wk/wv + biases
    scratch = batch_block * Nq * D * 4                   # ctx scratch
    budget = streamed + resident + scratch
    vmem_limit = min(max(int(budget * 1.5) + (4 << 20), 32 << 20), 64 << 20)

    kernel = functools.partial(
        _reasoning_attention_kernel,
        dim=D, bb=batch_block, nq=Nq, nk=Nk, scale=1.0 / math.sqrt(D))

    grid = (B // batch_block, Dout // tn)

    grid_spec = pltpu.PrefetchScalarGridSpec(
        num_scalar_prefetch=0,
        grid=grid,
        in_specs=[
            pl.BlockSpec((batch_block, Nq, D), lambda i, j: (i, 0, 0)),  # q
            pl.BlockSpec((batch_block, Nk, D), lambda i, j: (i, 0, 0)),  # k
            pl.BlockSpec((batch_block, Nk, D), lambda i, j: (i, 0, 0)),  # v
            pl.BlockSpec((D, D),   lambda i, j: (0, 0)),                 # wq
            pl.BlockSpec((1, D),   lambda i, j: (0, 0)),                 # bq
            pl.BlockSpec((D, D),   lambda i, j: (0, 0)),                 # wk
            pl.BlockSpec((1, D),   lambda i, j: (0, 0)),                 # bk
            pl.BlockSpec((D, D),   lambda i, j: (0, 0)),                 # wv
            pl.BlockSpec((1, D),   lambda i, j: (0, 0)),                 # bv
            pl.BlockSpec((D, tn),  lambda i, j: (0, j)),                 # wo tile
            pl.BlockSpec((1, tn),  lambda i, j: (0, j)),                 # bo tile
        ],
        out_specs=pl.BlockSpec((batch_block, Nq, tn), lambda i, j: (i, 0, j)),
        scratch_shapes=[pltpu.VMEM((batch_block * Nq, D), jnp.float32)],
    )

    return pl.pallas_call(
        kernel,
        out_shape=jax.ShapeDtypeStruct((B, Nq, Dout), jnp.float32),
        grid_spec=grid_spec,
        compiler_params=pltpu.CompilerParams(
            dimension_semantics=("parallel", "arbitrary"),
            vmem_limit_bytes=vmem_limit),
    )(qc, kc, vc, wq, bq, wk, bk, wv, bv, wo, bo)


def reasoning_attention_reference(q, k, v, params):
    """Pure-JAX (f32) reference mirroring the PyTorch forward."""
    D = q.shape[-1]
    f32 = jnp.float32
    qp = q.astype(f32) @ params["wq"].astype(f32) + params["bq"].astype(f32)
    kp = k.astype(f32) @ params["wk"].astype(f32) + params["bk"].astype(f32)
    vp = v.astype(f32) @ params["wv"].astype(f32) + params["bv"].astype(f32)
    scores = jnp.einsum("bqd,bkd->bqk", qp / math.sqrt(D), kp)
    attn = jax.nn.softmax(scores, axis=-1)
    ctx = jnp.einsum("bqk,bkd->bqd", attn, vp)
    return ctx @ params["wo"].astype(f32) + params["bo"].astype(f32)


def _xavier_normal(key, fan_in, fan_out, dtype):
    # torch.nn.init.xavier_normal_: std = sqrt(2 / (fan_in + fan_out)).
    std = math.sqrt(2.0 / (fan_in + fan_out))
    w = std * jax.random.normal(key, (fan_in, fan_out), dtype=jnp.float32)
    return w.astype(dtype)  # store pre-transposed (in, out)


def init_params(key, dim, out_dim, weight_dtype=jnp.bfloat16):
    keys = jax.random.split(key, 4)
    return {
        "wq": _xavier_normal(keys[0], dim, dim, weight_dtype),
        "bq": jnp.full((1, dim), 0.01, dtype=jnp.float32),
        "wk": _xavier_normal(keys[1], dim, dim, weight_dtype),
        "bk": jnp.full((1, dim), 0.01, dtype=jnp.float32),
        "wv": _xavier_normal(keys[2], dim, dim, weight_dtype),
        "bv": jnp.full((1, dim), 0.01, dtype=jnp.float32),
        "wo": _xavier_normal(keys[3], dim, out_dim, weight_dtype),
        "bo": jnp.full((1, out_dim), 0.01, dtype=jnp.float32),
    }


if __name__ == "__main__":
    # Small shapes consistent with the module's forward
    # (module defaults dim=768 / w_o out=18432; scaled down for the demo).
    # attn_mask / dropout are unused in the module's forward (None / 0.0).
    B, Nq, Nk, D, Dout = 2, 8, 16, 128, 256

    key = jax.random.PRNGKey(0)
    kq, kk, kv_, kp_ = jax.random.split(key, 4)
    q = jax.random.normal(kq, (B, Nq, D), dtype=jnp.float32)
    k = jax.random.normal(kk, (B, Nk, D), dtype=jnp.float32)
    v = jax.random.normal(kv_, (B, Nk, D), dtype=jnp.float32)
    params = init_params(kp_, D, Dout)  # bf16 weights, f32 biases

    # tn=128 exercises the Dout-tiled grid + persistent ctx scratch path.
    out_f32 = reasoning_attention_pallas(q, k, v, params, tn=128,
                                         compute_dtype=jnp.float32)
    out_bf16 = reasoning_attention_pallas(q, k, v, params, tn=128,
                                          compute_dtype=jnp.bfloat16)
    jax.block_until_ready((out_f32, out_bf16))

    ref = reasoning_attention_reference(q, k, v, params)
    assert out_f32.shape == (B, Nq, Dout)
    assert out_bf16.shape == (B, Nq, Dout)
    assert jnp.allclose(out_f32, ref, atol=2e-3, rtol=2e-3), "f32 mismatch vs reference"
    assert jnp.allclose(out_bf16, ref, atol=5e-2, rtol=5e-2), "bf16 mismatch vs reference"

    print("KERNEL_OK")
</pallas_src>

<mosaic_0001>
module attributes {stable_mosaic.version = 11 : i64} {
  func.func @_reasoning_attention_kernel(%arg0: i32, %arg1: i32, %arg2: memref<2x8x128xf32, #tpu.memory_space<vmem>>, %arg3: memref<2x16x128xf32, #tpu.memory_space<vmem>>, %arg4: memref<2x16x128xf32, #tpu.memory_space<vmem>>, %arg5: memref<128x128xf32, #tpu.memory_space<vmem>>, %arg6: memref<1x128xf32, #tpu.memory_space<vmem>>, %arg7: memref<128x128xf32, #tpu.memory_space<vmem>>, %arg8: memref<1x128xf32, #tpu.memory_space<vmem>>, %arg9: memref<128x128xf32, #tpu.memory_space<vmem>>, %arg10: memref<1x128xf32, #tpu.memory_space<vmem>>, %arg11: memref<128x128xf32, #tpu.memory_space<vmem>>, %arg12: memref<1x128xf32, #tpu.memory_space<vmem>>, %arg13: memref<2x8x128xf32, #tpu.memory_space<vmem>>, %arg14: memref<16x128xf32, #tpu.memory_space<vmem>>) attributes {dimension_semantics = [#tpu.dimension_semantics<parallel>, #tpu.dimension_semantics<arbitrary>], iteration_bounds = array<i64: 1, 2>, scalar_prefetch = 0 : i64, scratch_operands = 1 : i64, tpu.core_type = #tpu.core_type<tc>, window_params = [{transform_indices = @transform_0, window_bounds = array<i64: 2, 8, 128>}, {transform_indices = @transform_1, window_bounds = array<i64: 2, 16, 128>}, {transform_indices = @transform_2, window_bounds = array<i64: 2, 16, 128>}, {pipeline_mode = #tpu.pipeline_mode<synchronous>, transform_indices = @transform_3, window_bounds = array<i64: 128, 128>}, {pipeline_mode = #tpu.pipeline_mode<synchronous>, transform_indices = @transform_4, window_bounds = array<i64: 1, 128>}, {pipeline_mode = #tpu.pipeline_mode<synchronous>, transform_indices = @transform_5, window_bounds = array<i64: 128, 128>}, {pipeline_mode = #tpu.pipeline_mode<synchronous>, transform_indices = @transform_6, window_bounds = array<i64: 1, 128>}, {pipeline_mode = #tpu.pipeline_mode<synchronous>, transform_indices = @transform_7, window_bounds = array<i64: 128, 128>}, {pipeline_mode = #tpu.pipeline_mode<synchronous>, transform_indices = @transform_8, window_bounds = array<i64: 1, 128>}, {transform_indices = @transform_9, window_bounds = array<i64: 128, 128>}, {transform_indices = @transform_10, window_bounds = array<i64: 1, 128>}, {transform_indices = @transform_11, window_bounds = array<i64: 2, 8, 128>}]} {
    %c0_i32 = arith.constant 0 : i32
    %0 = arith.cmpi eq, %arg1, %c0_i32 : i32
    %1 = arith.extui %0 : i1 to i32
    %c0_i32_0 = arith.constant 0 : i32
    %2 = arith.cmpi ne, %1, %c0_i32_0 : i32
    scf.if %2 {
      %c0_9 = arith.constant 0 : index
      %c0_10 = arith.constant 0 : index
      %c0_11 = arith.constant 0 : index
      %11 = vector.load %arg2[%c0_9, %c0_10, %c0_11] : memref<2x8x128xf32, #tpu.memory_space<vmem>>, vector<2x8x128xf32>
      %12 = vector.shape_cast %11 : vector<2x8x128xf32> to vector<16x128xf32>
      %c0_12 = arith.constant 0 : index
      %c0_13 = arith.constant 0 : index
      %c0_14 = arith.constant 0 : index
      %13 = vector.load %arg3[%c0_12, %c0_13, %c0_14] : memref<2x16x128xf32, #tpu.memory_space<vmem>>, vector<2x16x128xf32>
      %14 = vector.shape_cast %13 : vector<2x16x128xf32> to vector<32x128xf32>
      %c0_15 = arith.constant 0 : index
      %c0_16 = arith.constant 0 : index
      %c0_17 = arith.constant 0 : index
      %15 = vector.load %arg4[%c0_15, %c0_16, %c0_17] : memref<2x16x128xf32, #tpu.memory_space<vmem>>, vector<2x16x128xf32>
      %16 = vector.shape_cast %15 : vector<2x16x128xf32> to vector<32x128xf32>
      %c0_18 = arith.constant 0 : index
      %c0_19 = arith.constant 0 : index
      %17 = vector.load %arg5[%c0_18, %c0_19] : memref<128x128xf32, #tpu.memory_space<vmem>>, vector<128x128xf32>
      %cst_20 = arith.constant dense<0.000000e+00> : vector<16x128xf32>
      %18 = tpu.matmul %12, %17, %cst_20 {dimension_numbers = #tpu.dot_dimension_numbers<[1], [0], [0], [1], [0, 0, 1, 1], [], []>} : vector<16x128xf32>, vector<128x128xf32>, vector<16x128xf32> -> vector<16x128xf32>
      %c0_21 = arith.constant 0 : index
      %c0_22 = arith.constant 0 : index
      %19 = vector.load %arg6[%c0_21, %c0_22] : memref<1x128xf32, #tpu.memory_space<vmem>>, vector<1x128xf32>
      %20 = vector.broadcast %19 : vector<1x128xf32> to vector<16x128xf32>
      %21 = arith.addf %18, %20 : vector<16x128xf32>
      %22 = vector.shape_cast %21 : vector<16x128xf32> to vector<2x8x128xf32>
      %c0_23 = arith.constant 0 : index
      %c0_24 = arith.constant 0 : index
      %23 = vector.load %arg7[%c0_23, %c0_24] : memref<128x128xf32, #tpu.memory_space<vmem>>, vector<128x128xf32>
      %cst_25 = arith.constant dense<0.000000e+00> : vector<32x128xf32>
      %24 = tpu.matmul %14, %23, %cst_25 {dimension_numbers = #tpu.dot_dimension_numbers<[1], [0], [0], [1], [0, 0, 1, 1], [], []>} : vector<32x128xf32>, vector<128x128xf32>, vector<32x128xf32> -> vector<32x128xf32>
      %c0_26 = arith.constant 0 : index
      %c0_27 = arith.constant 0 : index
      %25 = vector.load %arg8[%c0_26, %c0_27] : memref<1x128xf32, #tpu.memory_space<vmem>>, vector<1x128xf32>
      %26 = vector.broadcast %25 : vector<1x128xf32> to vector<32x128xf32>
      %27 = arith.addf %24, %26 : vector<32x128xf32>
      %28 = vector.shape_cast %27 : vector<32x128xf32> to vector<2x16x128xf32>
      %c0_28 = arith.constant 0 : index
      %c0_29 = arith.constant 0 : index
      %29 = vector.load %arg9[%c0_28, %c0_29] : memref<128x128xf32, #tpu.memory_space<vmem>>, vector<128x128xf32>
      %cst_30 = arith.constant dense<0.000000e+00> : vector<32x128xf32>
      %30 = tpu.matmul %16, %29, %cst_30 {dimension_numbers = #tpu.dot_dimension_numbers<[1], [0], [0], [1], [0, 0, 1, 1], [], []>} : vector<32x128xf32>, vector<128x128xf32>, vector<32x128xf32> -> vector<32x128xf32>
      %c0_31 = arith.constant 0 : index
      %c0_32 = arith.constant 0 : index
      %31 = vector.load %arg10[%c0_31, %c0_32] : memref<1x128xf32, #tpu.memory_space<vmem>>, vector<1x128xf32>
      %32 = vector.broadcast %31 : vector<1x128xf32> to vector<32x128xf32>
      %33 = arith.addf %30, %32 : vector<32x128xf32>
      %34 = vector.shape_cast %33 : vector<32x128xf32> to vector<2x16x128xf32>
      %cst_33 = arith.constant 0.0883883461 : f32
      %35 = vector.broadcast %cst_33 : f32 to vector<2x8x128xf32>
      %36 = arith.mulf %22, %35 : vector<2x8x128xf32>
      %cst_34 = arith.constant dense<0.000000e+00> : vector<2x8x16xf32>
      %37 = tpu.matmul %36, %28, %cst_34 {dimension_numbers = #tpu.dot_dimension_numbers<[2], [2], [1], [1], [0, 0, 0, 1, 1, 1], [0], [0]>} : vector<2x8x128xf32>, vector<2x16x128xf32>, vector<2x8x16xf32> -> vector<2x8x16xf32>
      %cst_35 = arith.constant dense<0xFF800000> : vector<2x8xf32>
      %38 = vector.multi_reduction <maximumf>, %37, %cst_35 [2] : vector<2x8x16xf32> to vector<2x8xf32>
      %39 = vector.shape_cast %38 : vector<2x8xf32> to vector<2x8x1xf32>
      %40 = vector.broadcast %39 : vector<2x8x1xf32> to vector<2x8x16xf32>
      %41 = arith.subf %37, %40 : vector<2x8x16xf32>
      %42 = math.exp %41 : vector<2x8x16xf32>
      %cst_36 = arith.constant dense<0.000000e+00> : vector<2x8xf32>
      %43 = vector.multi_reduction <add>, %42, %cst_36 [2] : vector<2x8x16xf32> to vector<2x8xf32>
      %44 = vector.shape_cast %43 : vector<2x8xf32> to vector<2x8x1xf32>
      %45 = tpu.reciprocal %44 {approx = true} : vector<2x8x1xf32> -> vector<2x8x1xf32>
      %46 = vector.broadcast %45 : vector<2x8x1xf32> to vector<2x8x16xf32>
      %47 = arith.mulf %42, %46 : vector<2x8x16xf32>
      %cst_37 = arith.constant dense<0.000000e+00> : vector<2x8x128xf32>
      %48 = tpu.matmul %47, %34, %cst_37 {dimension_numbers = #tpu.dot_dimension_numbers<[2], [1], [1], [2], [0, 0, 0, 1, 1, 2], [0], [0]>} : vector<2x8x16xf32>, vector<2x16x128xf32>, vector<2x8x128xf32> -> vector<2x8x128xf32>
      %49 = vector.shape_cast %48 : vector<2x8x128xf32> to vector<16x128xf32>
      %c0_38 = arith.constant 0 : index
      %c0_39 = arith.constant 0 : index
      %50 = vector.load %arg14[%c0_38, %c0_39] : memref<16x128xf32, #tpu.memory_space<vmem>>, vector<16x128xf32>
      tpu.vector_store %arg14[%c0_38, %c0_39], %49 {strides = array<i32>} : memref<16x128xf32, #tpu.memory_space<vmem>>, vector<16x128xf32>,
    } else {
    }
    %c0 = arith.constant 0 : index
    %c0_1 = arith.constant 0 : index
    %3 = vector.load %arg14[%c0, %c0_1] : memref<16x128xf32, #tpu.memory_space<vmem>>, vector<16x128xf32>
    %c0_2 = arith.constant 0 : index
    %c0_3 = arith.constant 0 : index
    %4 = vector.load %arg11[%c0_2, %c0_3] : memref<128x128xf32, #tpu.memory_space<vmem>>, vector<128x128xf32>
    %cst = arith.constant dense<0.000000e+00> : vector<16x128xf32>
    %5 = tpu.matmul %3, %4, %cst {dimension_numbers = #tpu.dot_dimension_numbers<[1], [0], [0], [1], [0, 0, 1, 1], [], []>} : vector<16x128xf32>, vector<128x128xf32>, vector<16x128xf32> -> vector<16x128xf32>
    %c0_4 = arith.constant 0 : index
    %c0_5 = arith.constant 0 : index
    %6 = vector.load %arg12[%c0_4, %c0_5] : memref<1x128xf32, #tpu.memory_space<vmem>>, vector<1x128xf32>
    %7 = vector.broadcast %6 : vector<1x128xf32> to vector<16x128xf32>
    %8 = arith.addf %5, %7 : vector<16x128xf32>
    %9 = vector.shape_cast %8 : vector<16x128xf32> to vector<2x8x128xf32>
    %c0_6 = arith.constant 0 : index
    %c0_7 = arith.constant 0 : index
    %c0_8 = arith.constant 0 : index
    %10 = vector.load %arg13[%c0_6, %c0_7, %c0_8] : memref<2x8x128xf32, #tpu.memory_space<vmem>>, vector<2x8x128xf32>
    tpu.vector_store %arg13[%c0_6, %c0_7, %c0_8], %9 {strides = array<i32>} : memref<2x8x128xf32, #tpu.memory_space<vmem>>, vector<2x8x128xf32>,
    return
  }
  func.func @transform_0(%arg0: i32, %arg1: i32) -> (i32, i32, i32) {
    %c0_i32 = arith.constant 0 : i32
    %c0_i32_0 = arith.constant 0 : i32
    %c0_i32_1 = arith.constant 0 : i32
    return %arg0, %c0_i32, %c0_i32_0 : i32, i32, i32
  }
  func.func @transform_1(%arg0: i32, %arg1: i32) -> (i32, i32, i32) {
    %c0_i32 = arith.constant 0 : i32
    %c0_i32_0 = arith.constant 0 : i32
    %c0_i32_1 = arith.constant 0 : i32
    return %arg0, %c0_i32, %c0_i32_0 : i32, i32, i32
  }
  func.func @transform_2(%arg0: i32, %arg1: i32) -> (i32, i32, i32) {
    %c0_i32 = arith.constant 0 : i32
    %c0_i32_0 = arith.constant 0 : i32
    %c0_i32_1 = arith.constant 0 : i32
    return %arg0, %c0_i32, %c0_i32_0 : i32, i32, i32
  }
  func.func @transform_3(%arg0: i32, %arg1: i32) -> (i32, i32) {
    %c0_i32 = arith.constant 0 : i32
    %c0_i32_0 = arith.constant 0 : i32
    %c0_i32_1 = arith.constant 0 : i32
    return %c0_i32, %c0_i32_0 : i32, i32
  }
  func.func @transform_4(%arg0: i32, %arg1: i32) -> (i32, i32) {
    %c0_i32 = arith.constant 0 : i32
    %c0_i32_0 = arith.constant 0 : i32
    %c0_i32_1 = arith.constant 0 : i32
    return %c0_i32, %c0_i32_0 : i32, i32
  }
  func.func @transform_5(%arg0: i32, %arg1: i32) -> (i32, i32) {
    %c0_i32 = arith.constant 0 : i32
    %c0_i32_0 = arith.constant 0 : i32
    %c0_i32_1 = arith.constant 0 : i32
    return %c0_i32, %c0_i32_0 : i32, i32
  }
  func.func @transform_6(%arg0: i32, %arg1: i32) -> (i32, i32) {
    %c0_i32 = arith.constant 0 : i32
    %c0_i32_0 = arith.constant 0 : i32
    %c0_i32_1 = arith.constant 0 : i32
    return %c0_i32, %c0_i32_0 : i32, i32
  }
  func.func @transform_7(%arg0: i32, %arg1: i32) -> (i32, i32) {
    %c0_i32 = arith.constant 0 : i32
    %c0_i32_0 = arith.constant 0 : i32
    %c0_i32_1 = arith.constant 0 : i32
    return %c0_i32, %c0_i32_0 : i32, i32
  }
  func.func @transform_8(%arg0: i32, %arg1: i32) -> (i32, i32) {
    %c0_i32 = arith.constant 0 : i32
    %c0_i32_0 = arith.constant 0 : i32
    %c0_i32_1 = arith.constant 0 : i32
    return %c0_i32, %c0_i32_0 : i32, i32
  }
  func.func @transform_9(%arg0: i32, %arg1: i32) -> (i32, i32) {
    %c0_i32 = arith.constant 0 : i32
    %c0_i32_0 = arith.constant 0 : i32
    return %c0_i32, %arg1 : i32, i32
  }
  func.func @transform_10(%arg0: i32, %arg1: i32) -> (i32, i32) {
    %c0_i32 = arith.constant 0 : i32
    %c0_i32_0 = arith.constant 0 : i32
    return %c0_i32, %arg1 : i32, i32
  }
  func.func @transform_11(%arg0: i32, %arg1: i32) -> (i32, i32, i32) {
    %c0_i32 = arith.constant 0 : i32
    %c0_i32_0 = arith.constant 0 : i32
    return %arg0, %c0_i32, %arg1 : i32, i32, i32
  }
}

</mosaic_0001>

<bundles_post_ra>
// kernel: tpu_custom_call.1
= control target key start
LH: loop header
LB: loop body
LE: loop exit
PB: predicated region body
PF: predicated region fallthrough
CT: control target
= control target key end

     0   :  { %s1876_s0 = inlined_call_operand.hbm [shape: f32[2,8,128], index: 0, kind: input, shape index: {}]   ;;  %s1877_s1 = inlined_call_operand.hbm [shape: f32[2,16,128], index: 1, kind: input, shape index: {}]   ;;  %s1878_s2 = inlined_call_operand.hbm [shape: f32[2,16,128], index: 2, kind: input, shape index: {}]   ;;  %s1879_s3 = inlined_call_operand.hbm [shape: f32[128,128], index: 3, kind: input, shape index: {}]   ;;  %s1880_s4 = inlined_call_operand.vmem [shape: f32[1,128], index: 4, kind: input, shape index: {}]   ;;  %s1881_s5 = inlined_call_operand.hbm [shape: f32[128,128], index: 5, kind: input, shape index: {}]   ;;  %s1882_s6 = inlined_call_operand.vmem [shape: f32[1,128], index: 6, kind: input, shape index: {}]   ;;  %s1883_s7 = inlined_call_operand.hbm [shape: f32[128,128], index: 7, kind: input, shape index: {}]   ;;  %s1884_s8 = inlined_call_operand.vmem [shape: f32[1,128], index: 8, kind: input, shape index: {}]   ;;  %s1885_s9 = inlined_call_operand.hbm [shape: f32[128,256], index: 9, kind: input, shape index: {}]   ;;  %s1886_s10 = inlined_call_operand.vmem [shape: f32[1,256], index: 10, kind: input, shape index: {}]   ;;  %s1887_s11 = inlined_call_operand.hbm [shape: f32[2,8,256], index: 11, kind: output, shape index: {}]  }
   0x1   :  { %1892 = sst [smem:[#allocation23_spill]] %s1876_s0 }
   0x2   :  { %1893 = sst [smem:[#allocation24_spill]] %s1877_s1 }
   0x3   :  { %1894 = sst [smem:[#allocation25_spill]] %s1878_s2 }
   0x4   :  { %1895 = sst [smem:[#allocation26_spill]] %s1879_s3 }
   0x5   :  { %1896 = sst [smem:[#allocation27_spill]] %s1881_s5 }
   0x6   :  { %1897 = sst [smem:[#allocation28_spill]] %s1883_s7 }
   0x7   :  { %1898 = sst [smem:[#allocation29_spill]] %s1884_s8 }
   0x8   :  { %1899 = sst [smem:[#allocation30_spill]] %s1887_s11 }
   0x9   :  { %16 = vsyncpa [#allocation4], 0 }
   0xa   :  { %17 = vsyncpa [#allocation7], 0 }
   0xb   :  { %18 = vsyncpa [#allocation10], 0 }
   0xc   :  { %19 = vsyncpa [#allocation13], 0 }
   0xd   :  { %20 = vsyncpa [#allocation5], 0 }
   0xe   :  { %22 = vsyncpa [#allocation5 + $0x1], 0  ;;  %s1616_s17 = smov 0   ;;  %s1618_s18 = smov 0  }
   0xf   :  { %s1620_s19 = smov 0   ;;  %s1622_s20 = smov 0  }
  0x10   :  { %s1624_s21 = smov 0   ;;  %s1626_s22 = smov 0  }
  0x11 LB: > { %s1647_s23 = sadd.s32 4294967295, %s1542_s22   ;;  %p1051_p0 = scmp.ge.s32.totalorder %s1542_s22, 1  ;;  %s1542_s22 = sphi %s1626_s22, %s28_s22   ;;  %s1538_s21 = sphi %s1624_s21, %s1922_s21   ;;  %s1534_s20 = sphi %s1622_s20, %s1921_s20   ;;  %s1530_s19 = sphi %s1620_s19, %s1920_s19   ;;  %s1526_s18 = sphi %s1618_s18, %s1919_s18   ;;  %s1522_s17 = sphi %s1616_s17, %s1918_s17  }
  0x12   : > { %p265_p1 = scmp.eq.s32.totalorder %s1647_s23, 0  ;;  %p329_p2 = scmp.lt.s32.totalorder %s1542_s22, 3 }
  0x13   : > { %s1900_s0 = sld [smem:[#allocation23_spill]]  ;;  %s1544_s28 = smov [#allocation3]  }
  0x14   : > { %p1655_p3 = pnand %p1051_p0, %p329_p2  ;;  %s345_s29 = sshll.u32 %s1544_s28, 4  ;;  %s346_s29 = int_to_ptr.vmem [resolvable:$true] %s345_s29 }
  0x15   : > { %p1058_p6 = scmp.ge.s32.totalorder %s1542_s22, 2  ;;  %s1903_s1 = sld [smem:[#allocation24_spill]] }
  0x16   : > { %p1121_p4 = pneg %p1655_p3  ;;  %s1889_s15 = smov 128  }
  0x17   : > { %s1890_s16 = smov 8   ;;  %s1547_s24 = smov [#allocation6]  }
  0x18   : > { %p1663_p5 = pnand %p1121_p4, %p265_p1  ;;  %s363_s25 = sshll.u32 %s1547_s24, 4  ;;  %s364_s25 = int_to_ptr.vmem [resolvable:$true] %s363_s25 }
  0x19   : > { %s343_s26 = sshll.u32 %s1900_s0, 4  ;;  %s1904_s3 = sld [smem:[#allocation26_spill]]  ;;  %s344_s26 = int_to_ptr.hbm [resolvable:$true] %s343_s26 }
  0x1a   : > { %1124 = dma.hbm_to_vmem [thread:$0]  (!%p1663_p5), %s344_s26, 256, %s346_s29, [#allocation4], %s1889_s15, %s1889_s15, %s1890_s16  }
  0x1b   : > { %s361_s14 = sshll.u32 %s1903_s1, 4  ;;  %s1905_s2 = sld [smem:[#allocation25_spill]]  ;;  %s362_s14 = int_to_ptr.hbm [resolvable:$true] %s361_s14 }
  0x1c   : > { %1127 = dma.hbm_to_vmem [thread:$0]  (!%p1663_p5), %s362_s14, 512, %s364_s25, [#allocation7], %s1889_s15, %s1889_s15, %s1890_s16  }
  0x1d   : > { %s1548_s8 = smov [#allocation9]   ;;  %s1549_s0 = smov [#allocation8]  }
  0x1e   : > { %s395_s26 = sshll.u32 %s1548_s8, 4  ;;  %s381_s29 = sshll.u32 %s1549_s0, 4  ;;  %s396_s26 = int_to_ptr.vmem [resolvable:$true] %s395_s26  ;;  %s382_s29 = int_to_ptr.vmem [resolvable:$true] %s381_s29 }
  0x1f   : > { %s393_s11 = sshll.u32 %s1904_s3, 4  ;;  %s1906_s5 = sld [smem:[#allocation27_spill]]  ;;  %s394_s11 = int_to_ptr.hbm [resolvable:$true] %s393_s11 }
  0x20   : > { %1133 = dma.hbm_to_vmem [thread:$0]  (!%p1663_p5), %s394_s11, 2048, %s396_s26, [#allocation10], %s1889_s15, %s1889_s15, %s1890_s16  }
  0x21   : > { %s379_s1 = sshll.u32 %s1905_s2, 4  ;;  %s1907_s7 = sld [smem:[#allocation28_spill]]  ;;  %s380_s1 = int_to_ptr.hbm [resolvable:$true] %s379_s1 }
  0x22   : > { %1130 = dma.hbm_to_vmem [thread:$0]  (!%p1663_p5), %s380_s1, 512, %s382_s29, [#allocation7], %s1889_s15, %s1889_s15, %s1890_s16  }
  0x23   : > { %s1550_s12 = smov [#allocation11]   ;;  %s1551_s26 = smov [#allocation12]  }
  0x24   : > { %s412_s13 = sshll.u32 %s1550_s12, 4  ;;  %s429_s1 = sshll.u32 %s1551_s26, 4  ;;  %s413_s13 = int_to_ptr.vmem [resolvable:$true] %s412_s13  ;;  %s430_s1 = int_to_ptr.vmem [resolvable:$true] %s429_s1 }
  0x25   : > { %s410_s25 = sshll.u32 %s1906_s5, 4  ;;  %s1050_s0 = sadd.s32 4294967294, %s1542_s22   ;;  %s411_s25 = int_to_ptr.hbm [resolvable:$true] %s410_s25 }
  0x26   : > { %1136 = dma.hbm_to_vmem [thread:$0]  (!%p1663_p5), %s411_s25, 2048, %s413_s13, [#allocation10], %s1889_s15, %s1889_s15, %s1890_s16  }
  0x27   : > { %s427_s28 = sshll.u32 %s1907_s7, 4  ;;  %s37_s29 = sadd.s32 1, %s1538_s21  ;;  %s428_s28 = int_to_ptr.hbm [resolvable:$true] %s427_s28 }
  0x28   : > { %1139 = dma.hbm_to_vmem [thread:$0]  (!%p1663_p5), %s428_s28, 2048, %s430_s1, [#allocation13], %s1889_s15, %s1889_s15, %s1890_s16  }
  0x29   : > { %p38_p7 = scmp.ge.s32.totalorder %s37_s29, 2  ;;  %s251_s24 = sadd.s32 1, %s1530_s19 }
  0x2a   : > { %p258_p8 = scmp.ne.s32.totalorder %s1530_s19, %s1526_s18  ;;  %p259_p9 = scmp.eq.s32.totalorder %s1542_s22, 0 }
  0x2b   : > { %s1924_s29 = smov (%p38_p7, %s37_s29), 0  ;;  %p264_p11 = scmp.ne.s32.totalorder %s1526_s18, %s1522_s17 }
  0x2c   : > { %1908 = sst [smem:[#allocation22_spill]] %s1924_s29  ;;  %p1721_p10 = por %p259_p9, %p258_p8 }
  0x2d   : > { %s248_s14 = ssub.s32 %s1538_s21, %s1924_s29  ;;  %p316_p12 = scmp.eq.s32.totalorder %s1647_s23, 1 }
  0x2e   : > { %p249_p13 = scmp.eq.s32.totalorder %s248_s14, 0  ;;  %p1732_p0 = por %p265_p1, %p264_p11 }
  0x2f   : > { %p1736_p2 = por %p316_p12, %p258_p8  ;;  %p322_p4 = scmp.eq.s32.totalorder %s1050_s0, 1 }
  0x30   : > { %s1741_s11 = scalar_select %p249_p13, %s1530_s19, %s251_s24  }
  0x31   : > { %p1743_p5 = por %p322_p4, %p264_p11  ;;  %p1154_p7 = scmp.lt.s32.totalorder %s1542_s22, 2 }
  0x32   : > { %s446_s12 = sand.u32 1, %s1542_s22   ;;  %s448_s13 = sand.u32 1, %s1530_s19  }
  0x33   : > { %s1059_s26 = sshll.u32 %s448_s13, 7  ;;  %s1060_s1 = sshll.u32 %s1538_s21, 3 }
  0x34   : > { %s454_s16 = scalar_lea.hbm %s1885_s9, %s1060_s1  ;;  %s450_s2 = scalar_lea.vmem [#allocation14], %s1059_s26 }
  0x35   : > { %s457_s3 = sshll.u32 %s450_s2, 4  ;;  %s455_s5 = sshll.u32 %s454_s16, 4  ;;  %s458_s3 = int_to_ptr.vmem [resolvable:$true] %s457_s3  ;;  %s456_s5 = int_to_ptr.hbm [resolvable:$true] %s455_s5 }
  0x36   : > { %p1141_p8 = pnand %p1154_p7, %p1721_p10  ;;  %s447_s0 = scalar_lea.sflag [#allocation4], %s446_s12 }
  0x37   : > { %s1552_s24 = smov 256   ;;  %s1913_s7 = smov 8  }
  0x38   : > { %s1914_s29 = smov 128   ;;  %475 = sbr.rel (%p1655_p3) target bundleno = 956 (0x3bc), region = 64 }
  0x39   : > { %1143 = dma.hbm_to_vmem [thread:$0]  (!%p1141_p8), %s456_s5, 2048, %s458_s3, %s447_s0, %s1552_s24, %s1914_s29, %s1913_s7  }
  0x3d   : > { %1497 = dma.done.wait (%p265_p1), [#allocation4], 256  }
  0x3e   : > { %1499 = vsyncadd (%p265_p1), [#allocation4], 4294967040 }
  0x3f   : > { %1501 = dma.done.wait (%p265_p1), [#allocation7], 1024  }
  0x40   : > { %1503 = vsyncadd (%p265_p1), [#allocation7], 4294966272 }
  0x41   : > { %1505 = dma.done.wait (%p265_p1), [#allocation10], 4096  }
  0x42   : > { %1507 = vsyncadd (%p265_p1), [#allocation10], 4294963200 }
  0x43   : > { %1509 = dma.done.wait (%p265_p1), [#allocation13], 2048  }
  0x44   : > { %1511 = vsyncadd (%p265_p1), [#allocation13], 4294965248  ;;  %s507_s2 = sand.u32 1, %s1647_s23   ;;  %s1778_s3 = sand.u32 1, %s1526_s18  }
  0x45   : > { %s1068_s5 = sshll.u32 %s1778_s3, 7  ;;  %s508_s7 = scalar_lea.sflag [#allocation4], %s507_s2 }
  0x46   : > { %s1781_s27 = scalar_lea.vmem [#allocation14], %s1068_s5 }
  0x47   : > { %1513 = dma.done.wait (%p1732_p0), %s508_s7, 2048  }
  0x48   : > { %1515 = vsyncadd (%p1732_p0), %s508_s7, 4294965248  ;;  %s1069_s15 = sshll.u32 %s1778_s3, 4  ;;  %p557_p1 = scmp.lt.s32.totalorder %s1534_s20, 1 }
  0x49   : > { %s1796_s12 = scalar_lea.vmem [#allocation15], %s1069_s15  ;;  %p1070_p3 = scmp.ne.s32.totalorder %s1534_s20, 0 }
  0x4a   : > { %s1790_s16 = scalar_select %p557_p1, %s1534_s20, 1 }
  0x4b   : > { %564 = sbr.rel (%p1070_p3) target bundleno = 790 (0x316), region = 96  ;;  %s1915_s24 = sld [smem:[#allocation29_spill]] (!%p1070_p3) }
  0x4c   : > { %s559_s30 = scalar_lea.vmem %s1886_s10, %s1790_s16 }
  0x50   : > { %v633_v0 = vld [vmem:[#allocation11 + $0x78] sm:$0xff]  ;;  %v632_v1 = vld [vmem:[#allocation11 + $0x70] sm:$0xff]  ;;  %v631_v2 = vld [vmem:[#allocation11 + $0x68] sm:$0xff]  ;;  %vm758_vm0 = vcmask 130048  }
  0x51   : > { %638 = vmatpush.msra.mxu1 %v633_v0  ;;  %v590_v3 = vld [vmem:[#allocation9 + $0x78] sm:$0xff]  ;;  %v589_v4 = vld [vmem:[#allocation9 + $0x70] sm:$0xff]  ;;  %v630_v5 = vld [vmem:[#allocation11 + $0x60] sm:$0xff] }
  0x52   : > { %595 = vmatpush.msra.mxu0 %v590_v3  ;;  %v588_v6 = vld [vmem:[#allocation9 + $0x68] sm:$0xff]  ;;  %v629_v7 = vld [vmem:[#allocation11 + $0x58] sm:$0xff]  ;;  %v587_v8 = vld [vmem:[#allocation9 + $0x60] sm:$0xff] }
  0x53   : > { %639 = vmatpush.msra.mxu1 %v632_v1  ;;  %v628_v9 = vld [vmem:[#allocation11 + $0x50] sm:$0xff]  ;;  %v586_v10 = vld [vmem:[#allocation9 + $0x58] sm:$0xff]  ;;  %v627_v11 = vld [vmem:[#allocation11 + $0x48] sm:$0xff] }
  0x54   : > { %596 = vmatpush.msra.mxu0 %v589_v4  ;;  %v585_v12 = vld [vmem:[#allocation9 + $0x50] sm:$0xff]  ;;  %v626_v13 = vld [vmem:[#allocation11 + $0x40] sm:$0xff]  ;;  %v584_v14 = vld [vmem:[#allocation9 + $0x48] sm:$0xff] }
  0x55   : > { %640 = vmatpush.msra.mxu1 %v631_v2  ;;  %v625_v15 = vld [vmem:[#allocation11 + $0x38] sm:$0xff]  ;;  %v583_v16 = vld [vmem:[#allocation9 + $0x40] sm:$0xff]  ;;  %v624_v17 = vld [vmem:[#allocation11 + $0x30] sm:$0xff] }
  0x56   : > { %597 = vmatpush.msra.mxu0 %v588_v6  ;;  %v582_v18 = vld [vmem:[#allocation9 + $0x38] sm:$0xff]  ;;  %v623_v19 = vld [vmem:[#allocation11 + $0x28] sm:$0xff]  ;;  %v581_v20 = vld [vmem:[#allocation9 + $0x30] sm:$0xff] }
  0x57   : > { %641 = vmatpush.msra.mxu1 %v630_v5  ;;  %v622_v21 = vld [vmem:[#allocation11 + $0x20] sm:$0xff]  ;;  %v580_v22 = vld [vmem:[#allocation9 + $0x28] sm:$0xff]  ;;  %v621_v23 = vld [vmem:[#allocation11 + $0x18] sm:$0xff] }
  0x58   : > { %598 = vmatpush.msra.mxu0 %v587_v8  ;;  %v579_v24 = vld [vmem:[#allocation9 + $0x20] sm:$0xff]  ;;  %v620_v25 = vld [vmem:[#allocation11 + $0x10] sm:$0xff]  ;;  %v578_v26 = vld [vmem:[#allocation9 + $0x18] sm:$0xff] }
  0x59   : > { %642 = vmatpush.msra.mxu1 %v629_v7  ;;  %v619_v27 = vld [vmem:[#allocation11 + $0x8] sm:$0xff]  ;;  %v577_v28 = vld [vmem:[#allocation9 + $0x10] sm:$0xff]  ;;  %v618_v29 = vld [vmem:[#allocation11] sm:$0xff] }
  0x5a   : > { %599 = vmatpush.msra.mxu0 %v586_v10  ;;  %v576_v30 = vld [vmem:[#allocation9 + $0x8] sm:$0xff]  ;;  %v567_v31 = vld [vmem:[#allocation6] sm:$0xff]  ;;  %v565_v33 = vld [vmem:[#allocation3] sm:$0xff] }
  0x5b   : > { %643 = vmatpush.msra.mxu1 %v628_v9  ;;  %v575_v32 = vld [vmem:[#allocation9] sm:$0xff]  ;;  %v568_v34 = vld [vmem:[#allocation6 + $0x8] sm:$0xff]  ;;  %v566_v35 = vld [vmem:[#allocation3 + $0x8] sm:$0xff] }
  0x5c   : > { %600 = vmatpush.msra.mxu0 %v585_v12  ;;  %v569_v36 = vld [vmem:[#allocation6 + $0x10] sm:$0xff]  ;;  %v570_v37 = vld [vmem:[#allocation6 + $0x18] sm:$0xff]  ;;  %v1223_v39 = vld [vmem:[%s1880_s4] ss:$0 sm:$0xff] }
  0x5d   : > { %644 = vmatpush.msra.mxu1 %v627_v11  ;;  %v1222_v40 = vld [vmem:[%s1882_s6] ss:$0 sm:$0xff]  ;;  %v682_v54 = vld [vmem:[#allocation12 + $0x78] sm:$0xff]  ;;  %v681_v55 = vld [vmem:[#allocation12 + $0x70] sm:$0xff] }
  0x5e   : > { %601 = vmatpush.msra.mxu0 %v584_v14  ;;  %687 = vmatpush.msra.mxu2 %v682_v54  ;;  %v680_v56 = vld [vmem:[#allocation12 + $0x68] sm:$0xff]  ;;  %v679_v57 = vld [vmem:[#allocation12 + $0x60] sm:$0xff]  ;;  %v678_v58 = vld [vmem:[#allocation12 + $0x58] sm:$0xff] }
  0x5f   : > { %645 = vmatpush.msra.mxu1 %v626_v13  ;;  %v677_v59 = vld [vmem:[#allocation12 + $0x50] sm:$0xff]  ;;  %v676_v60 = vld [vmem:[#allocation12 + $0x48] sm:$0xff]  ;;  %v675_v61 = vld [vmem:[#allocation12 + $0x40] sm:$0xff] }
  0x60   : > { %602 = vmatpush.msra.mxu0 %v583_v16  ;;  %688 = vmatpush.msra.mxu2 %v681_v55  ;;  %v674_v63 = vld [vmem:[#allocation12 + $0x38] sm:$0xff]  ;;  %v673_v1 = vld [vmem:[#allocation12 + $0x30] sm:$0xff]  ;;  %v672_v2 = vld [vmem:[#allocation12 + $0x28] sm:$0xff] }
  0x61   : > { %646 = vmatpush.msra.mxu1 %v625_v15  ;;  %v671_v3 = vld [vmem:[#allocation12 + $0x20] sm:$0xff]  ;;  %v670_v4 = vld [vmem:[#allocation12 + $0x18] sm:$0xff]  ;;  %v669_v5 = vld [vmem:[#allocation12 + $0x10] sm:$0xff] }
  0x62   : > { %603 = vmatpush.msra.mxu0 %v582_v18  ;;  %689 = vmatpush.msra.mxu2 %v680_v56  ;;  %v668_v6 = vld [vmem:[#allocation12 + $0x8] sm:$0xff]  ;;  %v667_v7 = vld [vmem:[#allocation12] sm:$0xff]  ;;  %v573_v12 = vld [vmem:[#allocation8 + $0x10] sm:$0xff] }
  0x63   : > { %647 = vmatpush.msra.mxu1 %v624_v17  ;;  %v571_v8 = vld [vmem:[#allocation8] sm:$0xff]  ;;  %v572_v11 = vld [vmem:[#allocation8 + $0x8] sm:$0xff]  ;;  %v574_v13 = vld [vmem:[#allocation8 + $0x18] sm:$0xff] }
  0x64   : > { %604 = vmatpush.msra.mxu0 %v581_v20  ;;  %690 = vmatpush.msra.mxu2 %v679_v57 }
  0x65   : > { %648 = vmatpush.msra.mxu1 %v623_v19 }
  0x66   : > { %605 = vmatpush.msra.mxu0 %v580_v22  ;;  %691 = vmatpush.msra.mxu2 %v678_v58 }
  0x67   : > { %649 = vmatpush.msra.mxu1 %v622_v21 }
  0x68   : > { %606 = vmatpush.msra.mxu0 %v579_v24  ;;  %692 = vmatpush.msra.mxu2 %v677_v59 }
  0x69   : > { %650 = vmatpush.msra.mxu1 %v621_v23 }
  0x6a   : > { %607 = vmatpush.msra.mxu0 %v578_v26  ;;  %693 = vmatpush.msra.mxu2 %v676_v60 }
  0x6b   : > { %651 = vmatpush.msra.mxu1 %v620_v25  ;;  %v1224_v25 = vld [vmem:[%s1915_s24] ss:$0 sm:$0xff] }
  0x6c   : > { %608 = vmatpush.msra.mxu0 %v577_v28  ;;  %694 = vmatpush.msra.mxu2 %v675_v61 }
  0x6d   : > { %652 = vmatpush.msra.mxu1 %v619_v27 }
  0x6e   : > { %609 = vmatpush.msra.mxu0 %v576_v30  ;;  %695 = vmatpush.msra.mxu2 %v674_v63 }
  0x6f   : > { %653 = vmatpush.msra.mxu1 %v618_v29 }
  0x70   : > { %654 = vmatmul.f32.vlgmr.msra.gmra.mxu1 %v567_v31  ;;  %610 = vmatpush.msra.mxu0 %v575_v32 }
  0x71   : > { %611 = vmatmul.f32.vlgmr.msra.gmra.mxu0 %v565_v33  ;;  %696 = vmatpush.msra.mxu2 %v673_v1 }
  0x73   : > { %697 = vmatpush.msra.mxu2 %v672_v2 }
  0x75   : > { %698 = vmatpush.msra.mxu2 %v671_v3 }
  0x77   : > { %699 = vmatpush.msra.mxu2 %v670_v4 }
  0x78   : > { %657 = vmatmul.f32.gmra.mxu1 %v568_v34 }
  0x79   : > { %614 = vmatmul.f32.gmra.mxu0 %v566_v35  ;;  %700 = vmatpush.msra.mxu2 %v669_v5 }
  0x7b   : > { %701 = vmatpush.msra.mxu2 %v668_v6 }
  0x7d   : > { %702 = vmatpush.msra.mxu2 %v667_v7 }
  0x7e   : > { %703 = vmatmul.f32.vlgmr.msra.gmra.mxu2 %v571_v8 }
  0x80   : > { %660 = vmatmul.f32.gmra.mxu1 %v569_v36 }
  0x86   : > { %706 = vmatmul.f32.gmra.mxu2 %v572_v11 }
  0x88   : > { %663 = vmatmul.f32.gmra.mxu1 %v570_v37 }
  0x8e   : > { %709 = vmatmul.f32.gmra.mxu2 %v573_v12 }
  0x96   : > { %712 = vmatmul.f32.gmra.mxu2 %v574_v13 }
  0xed   : > { %v655_v38 = vpop.f32.mrf.mxu1 }
  0xee   : > { %v612_v41 = vpop.f32.mrf.mxu0  ;;  %v656_v45 = vadd.f32 %v1222_v40, %v655_v38 }
  0xef   : > { %v613_v44 = vadd.f32 %v1223_v39, %v612_v41 }
  0xf1   : > { %v716_v46 = vmul.f32 0.088388346, %v613_v44 }
  0xf5   : > { %v658_v42 = vpop.f32.mrf.mxu1 }
  0xf6   : > { %v659_v43 = vadd.f32 %v1222_v40, %v658_v42  ;;  %v615_v48 = vpop.f32.mrf.mxu0 }
  0xf7   : > { %v616_v51 = vadd.f32 %v1223_v39, %v615_v48 }
  0xf8   : > { %732 = vmatpush.xpose.msra.mxu3 %v659_v43 }
  0xf9   : > { %v717_v53 = vmul.f32 0.088388346, %v616_v51 }
  0xfc   : > { %733 = vmatpush.xpose.msra.mxu3 %v656_v45 }
  0xfd   : > { %v661_v47 = vpop.f32.mrf.mxu1 }
  0xfe   : > { %v662_v52 = vadd.f32 %v1222_v40, %v661_v47 }
  0xff   : > { %734 = vmatmul.f32.vlgmr.msra.gmra.mxu3 %v716_v46 }
 0x101   : > { %v704_v24 = vpop.f32.mrf.mxu2 }
 0x102   : > { %v705_v27 = vadd.f32 %v1224_v25, %v704_v24 }
 0x105   : > { %v664_v49 = vpop.f32.mrf.mxu1 }
 0x106   : > { %v665_v50 = vadd.f32 %v1222_v40, %v664_v49 }
 0x108   : > { %752 = vmatpush.xpose.msrb.mxu3 %v665_v50 }
 0x109   : > { %v707_v26 = vpop.f32.mrf.mxu2 }
 0x10a   : > { %v708_v28 = vadd.f32 %v1224_v25, %v707_v26 }
 0x10c   : > { %753 = vmatpush.xpose.msrb.mxu3 %v662_v52 }
 0x10f   : > { %754 = vmatmul.f32.vlgmr.msrb.gmra.mxu3 %v717_v53 }
 0x110   : > { %798 = vmatpush.msra.mxu3 %v708_v28 }
 0x111   : > { %v710_v29 = vpop.f32.mrf.mxu2 }
 0x112   : > { %799 = vmatpush.msra.mxu3 %v705_v27  ;;  %v711_v31 = vadd.f32 %v1224_v25, %v710_v29 }
 0x119   : > { %v713_v30 = vpop.f32.mrf.mxu2 }
 0x11a   : > { %v714_v32 = vadd.f32 %v1224_v25, %v713_v30 }
 0x11c   : > { %821 = vmatpush.msrb.mxu3 %v714_v32 }
 0x11e   : > { %822 = vmatpush.msrb.mxu3 %v711_v31 }
 0x182   : > { %v735_v62 = vpop.f32.mrf.mxu3 }
 0x183   : > { %v759_v0 = vsel %vm758_vm0, %v735_v62, -inf }
 0x184   : > { %760 = vmax.xlane.f32.xlu0 %v759_v0 }
 0x192   : > { %v755_v9 = vpop.f32.mrf.mxu3 }
 0x193   : > { %v762_v10 = vsel %vm758_vm0, %v755_v9, -inf }
 0x194   : > { %763 = vmax.xlane.f32.xlu0 %v762_v10 }
 0x1f7   : > { %v761_v14 = vpop.xlane.xlu0 %760 }
 0x1f8   : > { %v765_v15 = vsub.f32 %v735_v62, %v761_v14 }
 0x1fa   : > { %v767_v16 = vmul.f32 1.442695, %v765_v15 }
 0x1fc   : > { %1225 = vpow2.f32 %v767_v16 }
 0x202   : > { %v1226_v17 = vpop.eup %1225 }
 0x203   : > { %v771_v18 = vsel %vm758_vm0, %v1226_v17, 0.0 }
 0x204   : > { %772 = vadd.xlane.f32.xlu1 %v771_v18 }
 0x207   : > { %v764_v19 = vpop.xlane.xlu0 %763 }
 0x208   : > { %v766_v20 = vsub.f32 %v755_v9, %v764_v19 }
 0x20a   : > { %v769_v21 = vmul.f32 1.442695, %v766_v20 }
 0x20c   : > { %1227 = vpow2.f32 %v769_v21 }
 0x212   : > { %v1228_v22 = vpop.eup %1227 }
 0x213   : > { %v774_v23 = vsel %vm758_vm0, %v1228_v22, 0.0 }
 0x214   : > { %775 = vadd.xlane.f32.xlu1 %v774_v23 }
 0x277   : > { %v773_v33 = vpop.xlane.xlu1 %772 }
 0x278   : > { %1229 = vrcp.f32 %v773_v33 }
 0x27e   : > { %v1230_v34 = vpop.eup %1229 }
 0x27f   : > { %v779_v35 = vmul.f32 %v1230_v34, %v1226_v17 }
 0x281   : > { %1071 = vmatmul.msk.f32.vlgmr.msra.gmra.mxu3 %vm758_vm0, %v779_v35 }
 0x287   : > { %v776_v36 = vpop.xlane.xlu1 %775 }
 0x288   : > { %1231 = vrcp.f32 %v776_v36 }
 0x28e   : > { %v1232_v37 = vpop.eup %1231 }
 0x28f   : > { %v780_v38 = vmul.f32 %v1232_v37, %v1228_v22 }
 0x291   : > { %1072 = vmatmul.msk.f32.vlgmr.msrb.gmra.mxu3 %vm758_vm0, %v780_v38 }
 0x304   : > { %v801_v39 = vpop.f32.mrf.mxu3 }
 0x305   : > { %827 = vst [vmem:[#allocation2] sm:$0xff] %v801_v39 }
 0x314   : > { %v824_v40 = vpop.f32.mrf.mxu3 }
 0x315   : > { %828 = vst [vmem:[#allocation2 + $0x8] sm:$0xff] %v824_v40 }
 0x316 PF: > { %v846_v41 = vld [vmem:[%s1781_s27 + $0x78] sm:$0xff]  ;;  %v845_v42 = vld [vmem:[%s1781_s27 + $0x70] sm:$0xff]  ;;  %v844_v43 = vld [vmem:[%s1781_s27 + $0x68] sm:$0xff]  ;;  %s1074_s2 = sshll.u32 %s1534_s20, 3  ;;  %s1916_s15 = sld [smem:[#allocation30_spill]] }
 0x317   : > { %851 = vmatpush.msra.mxu0 %v846_v41  ;;  %1077 = vmatpush.msra.mxu1 %v846_v41  ;;  %v843_v44 = vld [vmem:[%s1781_s27 + $0x60] sm:$0xff]  ;;  %v842_v45 = vld [vmem:[%s1781_s27 + $0x58] sm:$0xff]  ;;  %v841_v46 = vld [vmem:[%s1781_s27 + $0x50] sm:$0xff]  ;;  %s877_s20 = scalar_lea.sflag [#allocation5], %s1778_s3 }
 0x318   : > { %v840_v47 = vld [vmem:[%s1781_s27 + $0x48] sm:$0xff]  ;;  %v839_v48 = vld [vmem:[%s1781_s27 + $0x40] sm:$0xff]  ;;  %v838_v49 = vld [vmem:[%s1781_s27 + $0x38] sm:$0xff] }
 0x319   : > { %852 = vmatpush.msra.mxu0 %v845_v42  ;;  %1078 = vmatpush.msra.mxu1 %v845_v42  ;;  %v837_v50 = vld [vmem:[%s1781_s27 + $0x30] sm:$0xff]  ;;  %v836_v51 = vld [vmem:[%s1781_s27 + $0x28] sm:$0xff]  ;;  %v835_v52 = vld [vmem:[%s1781_s27 + $0x20] sm:$0xff] }
 0x31a   : > { %v834_v53 = vld [vmem:[%s1781_s27 + $0x18] sm:$0xff]  ;;  %v833_v54 = vld [vmem:[%s1781_s27 + $0x10] sm:$0xff]  ;;  %v832_v55 = vld [vmem:[%s1781_s27 + $0x8] sm:$0xff] }
 0x31b   : > { %853 = vmatpush.msra.mxu0 %v844_v43  ;;  %1079 = vmatpush.msra.mxu1 %v844_v43  ;;  %v831_v56 = vld [vmem:[%s1781_s27] sm:$0xff]  ;;  %s891_s27 = sshll.u32 %s1796_s12, 4  ;;  %s892_s27 = int_to_ptr.vmem [resolvable:$true] %s891_s27 }
 0x31c   : > { %v829_v57 = vld [vmem:[#allocation2] sm:$0xff]  ;;  %v830_v58 = vld [vmem:[#allocation2 + $0x8] sm:$0xff]  ;;  %s890_s23 = scalar_lea.hbm %s1916_s15, %s1074_s2  ;;  %s1464_s14 = scalar_lea.hbm %s1916_s15, 32 }
 0x31d   : > { %854 = vmatpush.msra.mxu0 %v843_v44  ;;  %1080 = vmatpush.msra.mxu1 %v843_v44  ;;  %v1233_v59 = vld [vmem:[%s559_s30] ss:$0 sm:$0xff]  ;;  %s893_s13 = sshll.u32 %s890_s23, 4  ;;  %s894_s13 = int_to_ptr.hbm [resolvable:$true] %s893_s13 }
 0x31e   : > { %s1458_s26 = sshra.s32 %s894_s13, 4  ;;  %s1459_s26 = int_to_ptr.hbm [resolvable:$true] %s1458_s26 }
 0x31f   : > { %855 = vmatpush.msra.mxu0 %v842_v45  ;;  %1081 = vmatpush.msra.mxu1 %v842_v45  ;;  %s1460_s1 = scalar_lea.hbm %s1459_s26, 16  ;;  %p1465_p12 = scmp.lt.s32.totalorder %s1459_s26, %s1916_s15 }
 0x320   : > { %p1461_p9 = scmp.ne.s32.totalorder %s1459_s26, %s1460_s1  ;;  %p1466_p13 = scmp.lt.s32.totalorder %s1464_s14, %s1460_s1 }
 0x321   : > { %856 = vmatpush.msra.mxu0 %v841_v46  ;;  %1082 = vmatpush.msra.mxu1 %v841_v46 }
 0x322   : > { %p1462_p10 = pnand %p1461_p9, %p1736_p2  ;;  %p1467_p0 = por %p1466_p13, %p1465_p12 }
 0x323   : > { %857 = vmatpush.msra.mxu0 %v840_v47  ;;  %1083 = vmatpush.msra.mxu1 %v840_v47 }
 0x324   : > { %p1463_p11 = pneg %p1462_p10 }
 0x325   : > { %858 = vmatpush.msra.mxu0 %v839_v48  ;;  %1084 = vmatpush.msra.mxu1 %v839_v48 }
 0x326   : > { %p1468_p4 = pnand %p1467_p0, %p1463_p11 }
 0x327   : > { %859 = vmatpush.msra.mxu0 %v838_v49  ;;  %1085 = vmatpush.msra.mxu1 %v838_v49 }
 0x329   : > { %860 = vmatpush.msra.mxu0 %v837_v50  ;;  %1086 = vmatpush.msra.mxu1 %v837_v50 }
 0x32b   : > { %861 = vmatpush.msra.mxu0 %v836_v51  ;;  %1087 = vmatpush.msra.mxu1 %v836_v51 }
 0x32d   : > { %862 = vmatpush.msra.mxu0 %v835_v52  ;;  %1088 = vmatpush.msra.mxu1 %v835_v52 }
 0x32f   : > { %863 = vmatpush.msra.mxu0 %v834_v53  ;;  %1089 = vmatpush.msra.mxu1 %v834_v53 }
 0x331   : > { %864 = vmatpush.msra.mxu0 %v833_v54  ;;  %1090 = vmatpush.msra.mxu1 %v833_v54 }
 0x333   : > { %865 = vmatpush.msra.mxu0 %v832_v55  ;;  %1091 = vmatpush.msra.mxu1 %v832_v55 }
 0x335   : > { %866 = vmatpush.msra.mxu0 %v831_v56  ;;  %1092 = vmatpush.msra.mxu1 %v831_v56 }
 0x336   : > { %867 = vmatmul.f32.vlgmr.msra.gmra.mxu0 %v829_v57  ;;  %870 = vmatmul.f32.vlgmr.msra.gmra.mxu1 %v830_v58 }
 0x3b3   : > { %v868_v60 = vpop.f32.mrf.mxu0  ;;  %v871_v61 = vpop.f32.mrf.mxu1 }
 0x3b4   : > { %v869_v62 = vadd.f32 %v1233_v59, %v868_v60  ;;  %v872_v63 = vadd.f32 %v1233_v59, %v871_v61 }
 0x3b6   : > { %874 = vst [vmem:[%s1796_s12] sm:$0xff] %v869_v62 }
 0x3b7   : > { %875 = vst [vmem:[%s1796_s12 + $0x8] sm:$0xff] %v872_v63 }
 0x3b8   : > { %1471 = shalt.err (!%p1468_p4)
}
 0x3b9   : > { %s1553_s3 = smov 128   ;;  %s1554_s12 = smov 256  }
 0x3ba   : > { %s1555_s2 = smov 8  }
 0x3bb   : > { %1119 = dma.vmem_to_hbm [thread:$0]  (%p1736_p2), %s892_s27, 256, %s894_s13, %s877_s20, %s1553_s3, %s1554_s12, %s1555_s2  }
 0x3bc PF: > { %s908_s5 = sand.u32 1, %s1522_s17   ;;  %p1145_p7 = pnand %p1058_p6, %p1743_p5 }
 0x3bd   : > { %s909_s7 = scalar_lea.sflag [#allocation5], %s908_s5 }
 0x3be   : > { %p1146_p8 = pneg %p1145_p7 }
 0x3c0   : > { %1517 = dma.done.wait (%p1146_p8), %s909_s7, 256  }
 0x3c1   : > { %1519 = vsyncadd (%p1146_p8), %s909_s7, 4294967040  ;;  %s28_s22 = sadd.s32 1, %s1542_s22   ;;  %s1917_s8 = sld [smem:[#allocation22_spill]] }
 0x3c2   : > { %p25_p1 = scmp.ge.s32.totalorder %s28_s22, 4   ;;  %s1918_s17 = smov %s1526_s18 }
 0x3c3   : > { %s1919_s18 = smov %s1530_s19  ;;  %s1920_s19 = smov %s1741_s11 }
 0x3c4   : > { %s1921_s20 = smov %s1538_s21  ;;  %27 = sbr.rel (!%p25_p1) target bundleno = 17 (0x11), region = 142 }
 0x3c7   : > { %s1922_s21 = smov %s1917_s8 }
 0x3c9   :  { %915 = vsyncpa [#allocation4], 1 }
 0x3ca   :  { %917 = vsyncpa [#allocation4 + $0x1], 1 }
 0x3cb   :  { %918 = vsyncpa [#allocation7], 1 }
 0x3cc   :  { %919 = vsyncpa [#allocation10], 1 }
 0x3cd   :  { %920 = vsyncpa [#allocation13], 1 }
 0x3ce   :  { %921 = vsyncpa [#allocation5], 1 }
 0x3cf   :  { %923 = vsyncpa [#allocation5 + $0x1], 1 }

</bundles_post_ra>
